<compile_context>
chip_gen: v6e
topology: v6e:2x2x1
jax: 0.10.0
libtpu: 0.0.40
codegen_flags: <defaults>
</compile_context>

<pallas_src>
import functools

import jax
import jax.numpy as jnp
from jax.experimental import pallas as pl
from jax.experimental.pallas import tpu as pltpu


def _round_up(x: int, m: int) -> int:
    return ((x + m - 1) // m) * m


# ----------------------------------------------------------------------------
# Fused kernel:  o = (relu(x @ W1 + b1)) @ W2 + b2      (all in VMEM)
# ----------------------------------------------------------------------------
def _mlp_fused_kernel(x_ref, w1_ref, b1_ref, w2_ref, b2_ref, o_ref, *,
                      mxu_bf16):
    x = x_ref[...]
    if mxu_bf16:
        # Weights arrive already bf16 (pre-cast once at init); only the
        # per-tile activation cast happens in-kernel.
        x = x.astype(jnp.bfloat16)

    # fc1 + bias + ReLU   -> hidden stays in vregs/VMEM, never leaves the chip
    h = jnp.dot(x, w1_ref[...], preferred_element_type=jnp.float32)
    h = jnp.maximum(h + b1_ref[...], 0.0)
    if mxu_bf16:
        h = h.astype(jnp.bfloat16)

    # fc2 + bias          -> lane-dense (padded-to-128) output store
    q = jnp.dot(h, w2_ref[...], preferred_element_type=jnp.float32)
    o_ref[...] = (q + b2_ref[...]).astype(o_ref.dtype)


def simple_linear_forward(x, params, n_actions, *, block_m=1024,
                          mxu_bf16=False, out_dtype=jnp.float32):
    """x: (M, input_size) f32 -> (M, n_actions) via one fused Pallas call.

    `n_actions`, `block_m`, `mxu_bf16`, `out_dtype` must be static.
    """
    if mxu_bf16:
        w1 = params["w1_bf16"]     # (K, H)    pre-transposed, pre-cast
        w2 = params["w2_bf16"]     # (H, Npad) pre-transposed, padded, pre-cast
    else:
        w1 = params["w1"]          # (K, H)
        w2 = params["w2"]          # (H, Npad)
    b1 = params["b1"]              # (1, H)   f32 (added after f32 accumulate)
    b2 = params["b2"]              # (1, Npad) f32

    M, K = x.shape
    H = w1.shape[1]
    Npad = w2.shape[1]

    # --- batch tiling ---------------------------------------------------
    # Tile the batch dim; pad M up to a multiple of the tile so the grid is
    # always exact (no ragged full-M fallback).  Cap the tile so mid/large
    # batches give >= 2 grid steps (keeps both v7x TensorCores busy and
    # enables double-buffered pipelining).
    bm = min(block_m, _round_up(M, 8))
    if M >= 16:
        bm = min(bm, _round_up(pl.cdiv(M, 2), 8))
    Mpad = _round_up(M, bm)
    grid = (Mpad // bm,)

    if Mpad != M:
        x = jnp.pad(x, ((0, Mpad - M), (0, 0)))   # zero rows, sliced off below

    flops = 2 * Mpad * (K * H + H * Npad)
    bytes_accessed = (x.dtype.itemsize * Mpad * K
                      + w1.dtype.itemsize * K * H
                      + w2.dtype.itemsize * H * Npad
                      + 4 * (H + Npad)
                      + jnp.dtype(out_dtype).itemsize * Mpad * Npad)

    kernel = functools.partial(_mlp_fused_kernel, mxu_bf16=mxu_bf16)
    out = pl.pallas_call(
        kernel,
        out_shape=jax.ShapeDtypeStruct((Mpad, Npad), out_dtype),
        grid_spec=pltpu.PrefetchScalarGridSpec(
            num_scalar_prefetch=0,
            grid=grid,
            in_specs=[
                pl.BlockSpec((bm, K), lambda i: (i, 0)),     # x tile
                pl.BlockSpec((K, H), lambda i: (0, 0)),      # W1 (resident)
                pl.BlockSpec((1, H), lambda i: (0, 0)),      # b1 (resident)
                pl.BlockSpec((H, Npad), lambda i: (0, 0)),   # W2 (resident)
                pl.BlockSpec((1, Npad), lambda i: (0, 0)),   # b2 (resident)
            ],
            out_specs=pl.BlockSpec((bm, Npad), lambda i: (i, 0)),
        ),
        compiler_params=pltpu.CompilerParams(
            dimension_semantics=("parallel",)),
        cost_estimate=pl.CostEstimate(
            flops=flops, transcendentals=0, bytes_accessed=bytes_accessed),
    )(x, w1, b1, w2, b2)

    # Drop padded batch rows and zero-padded output lanes (static slices).
    return out[:M, :n_actions]


# ----------------------------------------------------------------------------
# Parameter construction: PyTorch-like Linear init, stored pre-transposed
# (in_features, out_features), output dim zero-padded to a lane-dense 128,
# plus bf16 weight copies for the optional MXU-bf16 path.
# ----------------------------------------------------------------------------
def init_params(key, input_size, n_actions, hidden=128, lane=128):
    k1, k2, k3, k4 = jax.random.split(key, 4)

    def uniform(k, shape, fan_in):
        bound = 1.0 / jnp.sqrt(jnp.float32(fan_in))
        return jax.random.uniform(k, shape, jnp.float32, -bound, bound)

    n_pad = max(lane, _round_up(n_actions, lane))

    w1 = uniform(k1, (input_size, hidden), input_size)       # (K, H)
    b1 = uniform(k2, (1, hidden), input_size)                # (1, H)
    w2_core = uniform(k3, (hidden, n_actions), hidden)       # (H, n_actions)
    b2_core = uniform(k4, (1, n_actions), hidden)            # (1, n_actions)

    # Zero-pad the output dim to 128 lanes (padded columns compute to 0 and
    # are sliced away in the wrapper).
    w2 = jnp.zeros((hidden, n_pad), jnp.float32).at[:, :n_actions].set(w2_core)
    b2 = jnp.zeros((1, n_pad), jnp.float32).at[:, :n_actions].set(b2_core)

    return {
        "w1": w1, "b1": b1, "w2": w2, "b2": b2,
        # Pre-cast copies for the bf16 MXU path (cast once here, not per
        # grid step inside the kernel).  Fine on v5e/v6e/v7x alike.
        "w1_bf16": w1.astype(jnp.bfloat16),
        "w2_bf16": w2.astype(jnp.bfloat16),
    }


@functools.partial(jax.jit,
                   static_argnames=("n_actions", "block_m", "mxu_bf16"))
def forward(params, x, n_actions, block_m=1024, mxu_bf16=False):
    return simple_linear_forward(x, params, n_actions,
                                 block_m=block_m, mxu_bf16=mxu_bf16)


# ----------------------------------------------------------------------------
# Pure-JAX reference (for correctness check)
# ----------------------------------------------------------------------------
def forward_ref(params, x, n_actions):
    h = jnp.maximum(x @ params["w1"] + params["b1"], 0.0)
    return (h @ params["w2"] + params["b2"])[:, :n_actions]


if __name__ == "__main__":
    BATCH = 4
    INPUT_SIZE = 32
    N_ACTIONS = 6

    key = jax.random.PRNGKey(0)
    pkey, xkey, xkey2 = jax.random.split(key, 3)
    params = init_params(pkey, INPUT_SIZE, N_ACTIONS)

    # --- tiny batch (typical RL inference shape) -------------------------
    x = jax.random.normal(xkey, (BATCH, INPUT_SIZE), jnp.float32)
    q = forward(params, x, N_ACTIONS)
    jax.block_until_ready(q)
    assert q.shape == (BATCH, N_ACTIONS) and q.dtype == jnp.float32
    q_ref = forward_ref(params, x, N_ACTIONS)
    assert jnp.allclose(q, q_ref, rtol=1e-4, atol=1e-4), "f32 mismatch (tiny)"

    # --- larger ragged batch: exercises padding + multi-step grid --------
    x2 = jax.random.normal(xkey2, (100, INPUT_SIZE), jnp.float32)
    q2 = forward(params, x2, N_ACTIONS)
    jax.block_until_ready(q2)
    assert q2.shape == (100, N_ACTIONS)
    q2_ref = forward_ref(params, x2, N_ACTIONS)
    assert jnp.allclose(q2, q2_ref, rtol=1e-4, atol=1e-4), "f32 mismatch (big)"

    # --- bf16 MXU path (pre-cast weights), loose tolerance ---------------
    qb = forward(params, x, N_ACTIONS, mxu_bf16=True)
    jax.block_until_ready(qb)
    assert jnp.allclose(qb, q_ref, rtol=5e-2, atol=5e-2), "bf16 mismatch"

    print("KERNEL_OK")
</pallas_src>

<mosaic_0001>
module attributes {stable_mosaic.version = 11 : i64} {
  func.func @_mlp_fused_kernel(%arg0: i32, %arg1: memref<8x32xf32, #tpu.memory_space<vmem>>, %arg2: memref<32x128xf32, #tpu.memory_space<vmem>>, %arg3: memref<1x128xf32, #tpu.memory_space<vmem>>, %arg4: memref<128x128xf32, #tpu.memory_space<vmem>>, %arg5: memref<1x128xf32, #tpu.memory_space<vmem>>, %arg6: memref<8x128xf32, #tpu.memory_space<vmem>>) attributes {dimension_semantics = [#tpu.dimension_semantics<parallel>], iteration_bounds = array<i64: 1>, scalar_prefetch = 0 : i64, scratch_operands = 0 : i64, tpu.core_type = #tpu.core_type<tc>, window_params = [{transform_indices = @transform_0, window_bounds = array<i64: 8, 32>}, {pipeline_mode = #tpu.pipeline_mode<synchronous>, transform_indices = @transform_1, window_bounds = array<i64: 32, 128>}, {pipeline_mode = #tpu.pipeline_mode<synchronous>, transform_indices = @transform_2, window_bounds = array<i64: 1, 128>}, {pipeline_mode = #tpu.pipeline_mode<synchronous>, transform_indices = @transform_3, window_bounds = array<i64: 128, 128>}, {pipeline_mode = #tpu.pipeline_mode<synchronous>, transform_indices = @transform_4, window_bounds = array<i64: 1, 128>}, {transform_indices = @transform_5, window_bounds = array<i64: 8, 128>}]} {
    %c0 = arith.constant 0 : index
    %c0_0 = arith.constant 0 : index
    %0 = vector.load %arg1[%c0, %c0_0] : memref<8x32xf32, #tpu.memory_space<vmem>>, vector<8x32xf32>
    %c0_1 = arith.constant 0 : index
    %c0_2 = arith.constant 0 : index
    %1 = vector.load %arg2[%c0_1, %c0_2] : memref<32x128xf32, #tpu.memory_space<vmem>>, vector<32x128xf32>
    %cst = arith.constant dense<0.000000e+00> : vector<8x128xf32>
    %2 = tpu.matmul %0, %1, %cst {dimension_numbers = #tpu.dot_dimension_numbers<[1], [0], [0], [1], [0, 0, 1, 1], [], []>} : vector<8x32xf32>, vector<32x128xf32>, vector<8x128xf32> -> vector<8x128xf32>
    %c0_3 = arith.constant 0 : index
    %c0_4 = arith.constant 0 : index
    %3 = vector.load %arg3[%c0_3, %c0_4] : memref<1x128xf32, #tpu.memory_space<vmem>>, vector<1x128xf32>
    %4 = vector.broadcast %3 : vector<1x128xf32> to vector<8x128xf32>
    %5 = arith.addf %2, %4 : vector<8x128xf32>
    %cst_5 = arith.constant 0.000000e+00 : f32
    %6 = vector.broadcast %cst_5 : f32 to vector<8x128xf32>
    %7 = arith.maximumf %5, %6 : vector<8x128xf32>
    %c0_6 = arith.constant 0 : index
    %c0_7 = arith.constant 0 : index
    %8 = vector.load %arg4[%c0_6, %c0_7] : memref<128x128xf32, #tpu.memory_space<vmem>>, vector<128x128xf32>
    %cst_8 = arith.constant dense<0.000000e+00> : vector<8x128xf32>
    %9 = tpu.matmul %7, %8, %cst_8 {dimension_numbers = #tpu.dot_dimension_numbers<[1], [0], [0], [1], [0, 0, 1, 1], [], []>} : vector<8x128xf32>, vector<128x128xf32>, vector<8x128xf32> -> vector<8x128xf32>
    %c0_9 = arith.constant 0 : index
    %c0_10 = arith.constant 0 : index
    %10 = vector.load %arg5[%c0_9, %c0_10] : memref<1x128xf32, #tpu.memory_space<vmem>>, vector<1x128xf32>
    %11 = vector.broadcast %10 : vector<1x128xf32> to vector<8x128xf32>
    %12 = arith.addf %9, %11 : vector<8x128xf32>
    %c0_11 = arith.constant 0 : index
    %c0_12 = arith.constant 0 : index
    %13 = vector.load %arg6[%c0_11, %c0_12] : memref<8x128xf32, #tpu.memory_space<vmem>>, vector<8x128xf32>
    tpu.vector_store %arg6[%c0_11, %c0_12], %12 {strides = array<i32>} : memref<8x128xf32, #tpu.memory_space<vmem>>, vector<8x128xf32>,
    return
  }
  func.func @transform_0(%arg0: i32) -> (i32, i32) {
    %c0_i32 = arith.constant 0 : i32
    %c0_i32_0 = arith.constant 0 : i32
    return %arg0, %c0_i32 : i32, i32
  }
  func.func @transform_1(%arg0: i32) -> (i32, i32) {
    %c0_i32 = arith.constant 0 : i32
    %c0_i32_0 = arith.constant 0 : i32
    %c0_i32_1 = arith.constant 0 : i32
    return %c0_i32, %c0_i32_0 : i32, i32
  }
  func.func @transform_2(%arg0: i32) -> (i32, i32) {
    %c0_i32 = arith.constant 0 : i32
    %c0_i32_0 = arith.constant 0 : i32
    %c0_i32_1 = arith.constant 0 : i32
    return %c0_i32, %c0_i32_0 : i32, i32
  }
  func.func @transform_3(%arg0: i32) -> (i32, i32) {
    %c0_i32 = arith.constant 0 : i32
    %c0_i32_0 = arith.constant 0 : i32
    %c0_i32_1 = arith.constant 0 : i32
    return %c0_i32, %c0_i32_0 : i32, i32
  }
  func.func @transform_4(%arg0: i32) -> (i32, i32) {
    %c0_i32 = arith.constant 0 : i32
    %c0_i32_0 = arith.constant 0 : i32
    %c0_i32_1 = arith.constant 0 : i32
    return %c0_i32, %c0_i32_0 : i32, i32
  }
  func.func @transform_5(%arg0: i32) -> (i32, i32) {
    %c0_i32 = arith.constant 0 : i32
    %c0_i32_0 = arith.constant 0 : i32
    return %arg0, %c0_i32 : i32, i32
  }
}

</mosaic_0001>

<bundles_post_ra>
// kernel: forward.1
= control target key start
LH: loop header
LB: loop body
LE: loop exit
PB: predicated region body
PF: predicated region fallthrough
CT: control target
= control target key end

     0   :  { %10 = vsyncpa [#allocation3], 0  ;;  %s432_s0 = inlined_call_operand.vmem [shape: f32[8,32], index: 0, kind: input, shape index: {}]   ;;  %s433_s1 = inlined_call_operand.hbm [shape: f32[32,128], index: 1, kind: input, shape index: {}]   ;;  %s434_s2 = inlined_call_operand.vmem [shape: f32[1,128], index: 2, kind: input, shape index: {}]   ;;  %s435_s3 = inlined_call_operand.hbm [shape: f32[128,128], index: 3, kind: input, shape index: {}]   ;;  %s436_s4 = inlined_call_operand.vmem [shape: f32[1,128], index: 4, kind: input, shape index: {}]   ;;  %s437_s5 = inlined_call_operand.vmem [shape: f32[8,128], index: 5, kind: output, shape index: {}]  }
   0x1   :  { %11 = vsyncpa [#allocation5], 0  ;;  %s356_s18 = smov [#allocation2]  }
   0x2   :  { %s19_s19 = sshll.u32 %s356_s18, 4  ;;  %s20_s19 = int_to_ptr.vmem [resolvable:$true] %s19_s19 }
   0x3   :  { %s320_s20 = scalar_lea.vmem %s20_s19, 512  ;;  %p325_p1 = scmp.lt.s32.totalorder %s20_s19, %s20_s19 }
   0x4   :  { %p321_p0 = scmp.ne.s32.totalorder %s20_s19, %s320_s20  ;;  %p326_p2 = scmp.lt.s32.totalorder %s320_s20, %s320_s20 }
   0x6   :  { %p327_p3 = por %p326_p2, %p325_p1 }
   0x8   :  { %p328_p4 = pnand %p327_p3, %p321_p0 }
   0xa   :  { %331 = shalt.err (!%p328_p4)
}
   0xb   :  { %s357_s21 = smov 128   ;;  %s358_s22 = smov 8  }
   0xc   :  { %25 = dma.hbm_to_vmem [thread:$0]  %s433_s1, 512, %s20_s19, [#allocation3], %s357_s21, %s357_s21, %s358_s22  }
   0xd   :  { %s359_s25 = smov [#allocation4]  }
   0xe   :  { %s33_s26 = sshll.u32 %s359_s25, 4  ;;  %s34_s26 = int_to_ptr.vmem [resolvable:$true] %s33_s26 }
   0xf   :  { %s340_s27 = scalar_lea.vmem %s34_s26, 2048  ;;  %p345_p6 = scmp.lt.s32.totalorder %s34_s26, %s34_s26 }
  0x10   :  { %p341_p5 = scmp.ne.s32.totalorder %s34_s26, %s340_s27  ;;  %p346_p7 = scmp.lt.s32.totalorder %s340_s27, %s340_s27 }
  0x12   :  { %p347_p8 = por %p346_p7, %p345_p6 }
  0x14   :  { %p348_p9 = pnand %p347_p8, %p341_p5 }
  0x16   :  { %351 = shalt.err (!%p348_p9)
}
  0x17   :  { %39 = dma.hbm_to_vmem [thread:$0]  %s435_s3, 2048, %s34_s26, [#allocation5], %s357_s21, %s357_s21, %s358_s22  }
  0x18   :  { %352 = dma.done.wait [#allocation3], 512  }
  0x19   :  { %353 = vsyncadd [#allocation3], 4294966784 }
  0x1a   :  { %354 = dma.done.wait [#allocation5], 2048  }
  0x1b   :  { %355 = vsyncadd [#allocation5], 4294965248  ;;  %v360_v0 = vmov 0.0   ;;  %vm361_vm0 = vmmov 0   ;;  %v52_v1 = vld [vmem:[#allocation2 + $0x18] sm:$0xff]  ;;  %v51_v2 = vld [vmem:[#allocation2 + $0x10] sm:$0xff] }
  0x1c   :  { %260 = vmatprep.subr.mxu0 %v360_v0  ;;  %268 = vmatprep.mubr.msk.f32.mxu0 %vm361_vm0, %v360_v0  ;;  %v150_v3 = vld [vmem:[#allocation4 + $0x78] sm:$0xff]  ;;  %v50_v4 = vld [vmem:[#allocation2 + $0x8] sm:$0xff]  ;;  %v149_v5 = vld [vmem:[#allocation4 + $0x70] sm:$0xff]  ;;  %vm60_vm1 = vcmask 261120  }
  0x1d   :  { %271 = vmatprep.subr.mxu1 %v360_v0  ;;  %303 = vmatprep.mubr.msk.f32.mxu1 %vm361_vm0, %v360_v0  ;;  %v148_v6 = vld [vmem:[#allocation4 + $0x68] sm:$0xff]  ;;  %v49_v7 = vld [vmem:[#allocation2] sm:$0xff]  ;;  %v146_v10 = vld [vmem:[#allocation4 + $0x58] sm:$0xff] }
  0x1e   :  { %261 = vmatpush3.msra.mxu0 %v52_v1  ;;  %272 = vmatpush3.msra.mxu1 %v150_v3  ;;  %v48_v8 = vld [vmem:[%s432_s0] sm:$0xff]  ;;  %v145_v11 = vld [vmem:[#allocation4 + $0x50] sm:$0xff]  ;;  %v144_v12 = vld [vmem:[#allocation4 + $0x48] sm:$0xff] }
  0x1f   :  { %262 = vmatprep.subr.mxu0 %v360_v0  ;;  %273 = vmatprep.subr.mxu1 %v360_v0  ;;  %v147_v9 = vld [vmem:[#allocation4 + $0x60] sm:$0xff]  ;;  %v142_v14 = vld [vmem:[#allocation4 + $0x38] sm:$0xff]  ;;  %v141_v15 = vld [vmem:[#allocation4 + $0x30] sm:$0xff] }
  0x20   :  { %263 = vmatpush3.msra.mxu0 %v51_v2  ;;  %274 = vmatpush3.msra.mxu1 %v149_v5  ;;  %v143_v13 = vld [vmem:[#allocation4 + $0x40] sm:$0xff]  ;;  %v140_v16 = vld [vmem:[#allocation4 + $0x28] sm:$0xff]  ;;  %v138_v18 = vld [vmem:[#allocation4 + $0x18] sm:$0xff] }
  0x21   :  { %264 = vmatprep.subr.mxu0 %v360_v0  ;;  %275 = vmatprep.subr.mxu1 %v360_v0  ;;  %v139_v17 = vld [vmem:[#allocation4 + $0x20] sm:$0xff]  ;;  %v137_v19 = vld [vmem:[#allocation4 + $0x10] sm:$0xff]  ;;  %v136_v20 = vld [vmem:[#allocation4 + $0x8] sm:$0xff] }
  0x22   :  { %265 = vmatpush3.msra.mxu0 %v50_v4  ;;  %276 = vmatpush3.msra.mxu1 %v148_v6  ;;  %v135_v21 = vld [vmem:[#allocation4] sm:$0xff] }
  0x23   :  { %266 = vmatprep.subr.mxu0 %v360_v0  ;;  %277 = vmatprep.subr.mxu1 %v360_v0  ;;  %v235_v22 = vld [vmem:[%s434_s2] ss:$0 sm:$0xff] }
  0x24   :  { %267 = vmatpush3.msra.mxu0 %v49_v7  ;;  %278 = vmatpush3.msra.mxu1 %v147_v9  ;;  %v237_v27 = vld [vmem:[%s436_s4] ss:$0 sm:$0xff] }
  0x25   :  { %269 = vmatmul.mubr.msk.f32.vlgmr.msra.gmra.mxu0 %vm60_vm1, %v48_v8  ;;  %279 = vmatprep.subr.mxu1 %v360_v0 }
  0x26   :  { %280 = vmatpush3.msra.mxu1 %v146_v10 }
  0x27   :  { %281 = vmatprep.subr.mxu1 %v360_v0 }
  0x28   :  { %282 = vmatpush3.msra.mxu1 %v145_v11 }
  0x29   :  { %283 = vmatprep.subr.mxu1 %v360_v0 }
  0x2a   :  { %284 = vmatpush3.msra.mxu1 %v144_v12 }
  0x2b   :  { %285 = vmatprep.subr.mxu1 %v360_v0 }
  0x2c   :  { %286 = vmatpush3.msra.mxu1 %v143_v13 }
  0x2d   :  { %287 = vmatprep.subr.mxu1 %v360_v0 }
  0x2e   :  { %288 = vmatpush3.msra.mxu1 %v142_v14 }
  0x2f   :  { %289 = vmatprep.subr.mxu1 %v360_v0 }
  0x30   :  { %290 = vmatpush3.msra.mxu1 %v141_v15 }
  0x31   :  { %291 = vmatprep.subr.mxu1 %v360_v0 }
  0x32   :  { %292 = vmatpush3.msra.mxu1 %v140_v16 }
  0x33   :  { %293 = vmatprep.subr.mxu1 %v360_v0 }
  0x34   :  { %294 = vmatpush3.msra.mxu1 %v139_v17 }
  0x35   :  { %295 = vmatprep.subr.mxu1 %v360_v0 }
  0x36   :  { %296 = vmatpush3.msra.mxu1 %v138_v18 }
  0x37   :  { %297 = vmatprep.subr.mxu1 %v360_v0 }
  0x38   :  { %298 = vmatpush3.msra.mxu1 %v137_v19 }
  0x39   :  { %299 = vmatprep.subr.mxu1 %v360_v0 }
  0x3a   :  { %300 = vmatpush3.msra.mxu1 %v136_v20 }
  0x3b   :  { %301 = vmatprep.subr.mxu1 %v360_v0 }
  0x3c   :  { %302 = vmatpush3.msra.mxu1 %v135_v21 }
  0xe5   :  { %v130_v23 = vpop.f32.mrf.mxu0 }
  0xe6   :  { %v131_v24 = vadd.f32 %v235_v22, %v130_v23 }
  0xe7   :  { %v270_v25 = vpop.f32.mrf.mxu0 }
  0xe8   :  { %v134_v26 = vmax.f32 %v131_v24, 0.0 }
  0xea   :  { %304 = vmatmul.mubr.f32.vlgmr.msra.gmra.mxu1 %v134_v26 }
 0x1aa   :  { %v224_v28 = vpop.f32.mrf.mxu1 }
 0x1ab   :  { %v225_v29 = vadd.f32 %v237_v27, %v224_v28 }
 0x1ac   :  { %v305_v30 = vpop.f32.mrf.mxu1 }
 0x1ad   :  { %228 = vst [vmem:[%s437_s5] sm:$0xff] %v225_v29 }
 0x1ae   :  { %233 = vsyncpa [#allocation3], 1 }
 0x1af   :  { %234 = vsyncpa [#allocation5], 1 }

</bundles_post_ra>
